<compile_context>
chip_gen: v5e
topology: v5e:2x2
jax: 0.10.0
libtpu: 0.0.40
codegen_flags: <defaults>
</compile_context>

<pallas_src>
import functools

import jax
import jax.numpy as jnp
from jax.experimental import pallas as pl
from jax.experimental.pallas import tpu as pltpu


def _linear_softmax_kernel(x_ref, w_ref, b_ref, o_ref):
    # logits = x @ W_t + b on the MXU; class axis is lane-dense (Cp = k*128).
    logits = jnp.dot(
        x_ref[...], w_ref[...], preferred_element_type=jnp.float32
    ) + b_ref[...]                                   # (TB, Cp); bias broadcasts over rows

    # Numerically-stable softmax along the padded class axis.
    # Pad columns have logit -1e30 -> exp underflows to exactly 0 (f32), so the
    # softmax over the real classes is unchanged.
    m = jnp.max(logits, axis=-1, keepdims=True)      # (TB, 1)
    e = jnp.exp(logits - m)                          # (TB, Cp)
    s = jnp.sum(e, axis=-1, keepdims=True)           # (TB, 1)
    probs = e / s                                    # exact division (HBM-bound kernel)

    # Store only the real classes; (TB, C) with C == full output extent is a
    # legal block (masked vst — cheaper than an extra XLA slice pass over HBM).
    C = o_ref.shape[-1]
    o_ref[...] = probs[:, :C].astype(o_ref.dtype)


@functools.partial(jax.jit, static_argnames=("block_b", "out_dtype"))
def linear_classifier_aum(x, weight, bias, *, block_b=2048, out_dtype=jnp.float32):
    """x: (B, D) f32, weight: (C, D) f32 (PyTorch layout), bias: (C,) f32 -> (B, C) probs."""
    B, D = x.shape
    C = weight.shape[0]

    # --- one-time (tiny) weight/bias prep: lane-dense padded class axis -------
    Cp = pl.cdiv(C, 128) * 128
    w_t = jnp.pad(weight, ((0, Cp - C), (0, 0))).T                    # (D, Cp), zero pad cols
    b_p = jnp.pad(bias.reshape(1, C), ((0, 0), (0, Cp - C)),
                  constant_values=-1e30)                              # pad logits -> -1e30

    # --- batch tile selection --------------------------------------------------
    # Large tiles amortize the ~0.35 us per-grid-step overhead; keep >= 2 grid
    # steps when possible so both v7x TensorCores get work. TB is a multiple of
    # 8 (or the full batch), and the last block may be ragged (Pallas clips the
    # boundary DMAs; the garbage rows' softmax is computed and discarded).
    if B <= 16:
        TB = B                                     # full-extent block (legal for any B)
    else:
        half = -(-B // 2)                          # cdiv(B, 2)
        half = -(-half // 8) * 8                   # round up to a multiple of 8
        TB = min(block_b, half)
    grid = (pl.cdiv(B, TB),)

    out = pl.pallas_call(
        _linear_softmax_kernel,
        out_shape=jax.ShapeDtypeStruct((B, C), out_dtype),
        grid_spec=pltpu.PrefetchScalarGridSpec(
            num_scalar_prefetch=0,
            grid=grid,
            in_specs=[
                pl.BlockSpec((TB, D), lambda i: (i, 0)),    # streamed x tile
                pl.BlockSpec((D, Cp), lambda i: (0, 0)),    # resident weight (D, Cp)
                pl.BlockSpec((1, Cp), lambda i: (0, 0)),    # resident bias
            ],
            out_specs=pl.BlockSpec((TB, C), lambda i: (i, 0)),  # direct (B, C) output
        ),
        compiler_params=pltpu.CompilerParams(
            dimension_semantics=("parallel",),              # megacore on v7x
        ),
    )(x, w_t, b_p)

    return out


def _ref(x, weight, bias):
    return jax.nn.softmax(x @ weight.T + bias, axis=1)


if __name__ == "__main__":
    key = jax.random.PRNGKey(0)
    kx, kw, kb, kx2 = jax.random.split(key, 4)

    # Small shapes consistent with the module: batch=8, input_dim=32, num_classes=10
    B, D, C = 8, 32, 10
    x = jax.random.normal(kx, (B, D), dtype=jnp.float32)
    bound = 1.0 / (D ** 0.5)
    weight = jax.random.uniform(kw, (C, D), minval=-bound, maxval=bound, dtype=jnp.float32)
    bias = jax.random.uniform(kb, (C,), minval=-bound, maxval=bound, dtype=jnp.float32)

    probs = jax.block_until_ready(linear_classifier_aum(x, weight, bias))
    ref = _ref(x, weight, bias)
    assert probs.shape == (B, C)
    assert jnp.allclose(probs, ref, atol=1e-5, rtol=1e-5)
    assert jnp.allclose(jnp.sum(probs, axis=1), 1.0, atol=1e-5)

    # Larger, non-divisible batch: exercises the multi-step grid (2 tiles of
    # 256 at B=500), the ragged last block (no jnp.pad of x), and the direct
    # (B, C) masked-store output path.
    B2 = 500
    x2 = jax.random.normal(kx2, (B2, D), dtype=jnp.float32)
    probs2 = jax.block_until_ready(linear_classifier_aum(x2, weight, bias))
    ref2 = _ref(x2, weight, bias)
    assert probs2.shape == (B2, C)
    assert jnp.allclose(probs2, ref2, atol=1e-5, rtol=1e-5)
    assert jnp.allclose(jnp.sum(probs2, axis=1), 1.0, atol=1e-5)

    print("KERNEL_OK")
</pallas_src>

<mosaic_0001>
module attributes {stable_mosaic.version = 11 : i64} {
  func.func @_linear_softmax_kernel(%arg0: i32, %arg1: memref<8x32xf32, #tpu.memory_space<vmem>>, %arg2: memref<32x128xf32, #tpu.memory_space<vmem>>, %arg3: memref<1x128xf32, #tpu.memory_space<vmem>>, %arg4: memref<8x10xf32, #tpu.memory_space<vmem>>) attributes {dimension_semantics = [#tpu.dimension_semantics<parallel>], iteration_bounds = array<i64: 1>, scalar_prefetch = 0 : i64, scratch_operands = 0 : i64, tpu.core_type = #tpu.core_type<tc>, window_params = [{transform_indices = @transform_0, window_bounds = array<i64: 8, 32>}, {pipeline_mode = #tpu.pipeline_mode<synchronous>, transform_indices = @transform_1, window_bounds = array<i64: 32, 128>}, {pipeline_mode = #tpu.pipeline_mode<synchronous>, transform_indices = @transform_2, window_bounds = array<i64: 1, 128>}, {transform_indices = @transform_3, window_bounds = array<i64: 8, 10>}]} {
    %c0 = arith.constant 0 : index
    %c0_0 = arith.constant 0 : index
    %0 = vector.load %arg1[%c0, %c0_0] : memref<8x32xf32, #tpu.memory_space<vmem>>, vector<8x32xf32>
    %c0_1 = arith.constant 0 : index
    %c0_2 = arith.constant 0 : index
    %1 = vector.load %arg2[%c0_1, %c0_2] : memref<32x128xf32, #tpu.memory_space<vmem>>, vector<32x128xf32>
    %cst = arith.constant dense<0.000000e+00> : vector<8x128xf32>
    %2 = tpu.matmul %0, %1, %cst {dimension_numbers = #tpu.dot_dimension_numbers<[1], [0], [0], [1], [0, 0, 1, 1], [], []>} : vector<8x32xf32>, vector<32x128xf32>, vector<8x128xf32> -> vector<8x128xf32>
    %c0_3 = arith.constant 0 : index
    %c0_4 = arith.constant 0 : index
    %3 = vector.load %arg3[%c0_3, %c0_4] : memref<1x128xf32, #tpu.memory_space<vmem>>, vector<1x128xf32>
    %4 = vector.broadcast %3 : vector<1x128xf32> to vector<8x128xf32>
    %5 = arith.addf %2, %4 : vector<8x128xf32>
    %cst_5 = arith.constant dense<0xFF800000> : vector<8xf32>
    %6 = vector.multi_reduction <maximumf>, %5, %cst_5 [1] : vector<8x128xf32> to vector<8xf32>
    %7 = vector.shape_cast %6 : vector<8xf32> to vector<8x1xf32>
    %8 = vector.broadcast %7 : vector<8x1xf32> to vector<8x128xf32>
    %9 = arith.subf %5, %8 : vector<8x128xf32>
    %10 = math.exp %9 : vector<8x128xf32>
    %cst_6 = arith.constant dense<0.000000e+00> : vector<8xf32>
    %11 = vector.multi_reduction <add>, %10, %cst_6 [1] : vector<8x128xf32> to vector<8xf32>
    %12 = vector.shape_cast %11 : vector<8xf32> to vector<8x1xf32>
    %13 = vector.broadcast %12 : vector<8x1xf32> to vector<8x128xf32>
    %14 = arith.divf %10, %13 : vector<8x128xf32>
    %15 = vector.extract_strided_slice %14 {offsets = [0, 0], sizes = [8, 10], strides = [1, 1]} : vector<8x128xf32> to vector<8x10xf32>
    %c0_7 = arith.constant 0 : index
    %c0_8 = arith.constant 0 : index
    %16 = vector.load %arg4[%c0_7, %c0_8] : memref<8x10xf32, #tpu.memory_space<vmem>>, vector<8x10xf32>
    tpu.vector_store %arg4[%c0_7, %c0_8], %15 {strides = array<i32>} : memref<8x10xf32, #tpu.memory_space<vmem>>, vector<8x10xf32>,
    return
  }
  func.func @transform_0(%arg0: i32) -> (i32, i32) {
    %c0_i32 = arith.constant 0 : i32
    %c0_i32_0 = arith.constant 0 : i32
    return %arg0, %c0_i32 : i32, i32
  }
  func.func @transform_1(%arg0: i32) -> (i32, i32) {
    %c0_i32 = arith.constant 0 : i32
    %c0_i32_0 = arith.constant 0 : i32
    %c0_i32_1 = arith.constant 0 : i32
    return %c0_i32, %c0_i32_0 : i32, i32
  }
  func.func @transform_2(%arg0: i32) -> (i32, i32) {
    %c0_i32 = arith.constant 0 : i32
    %c0_i32_0 = arith.constant 0 : i32
    %c0_i32_1 = arith.constant 0 : i32
    return %c0_i32, %c0_i32_0 : i32, i32
  }
  func.func @transform_3(%arg0: i32) -> (i32, i32) {
    %c0_i32 = arith.constant 0 : i32
    %c0_i32_0 = arith.constant 0 : i32
    return %arg0, %c0_i32 : i32, i32
  }
}

</mosaic_0001>

<bundles_post_ra>
// kernel: linear_classifier_aum.1
= control target key start
LH: loop header
LB: loop body
LE: loop exit
PB: predicated region body
PF: predicated region fallthrough
CT: control target
= control target key end

     0   :  { %s163_s0 = inlined_call_operand.vmem [shape: f32[8,32], index: 0, kind: input, shape index: {}]   ;;  %s164_s1 = inlined_call_operand.vmem [shape: f32[32,128], index: 1, kind: input, shape index: {}]   ;;  %s165_s2 = inlined_call_operand.vmem [shape: f32[1,128], index: 2, kind: input, shape index: {}]   ;;  %s166_s3 = inlined_call_operand.hbm [shape: f32[8,10], index: 3, kind: output, shape index: {}]  }
   0x1   :  { %v19_v0 = vld [vmem:[%s164_s1 + $0x18] sm:$0xff]  ;;  %v18_v1 = vld [vmem:[%s164_s1 + $0x10] sm:$0xff]  ;;  %v17_v2 = vld [vmem:[%s164_s1 + $0x8] sm:$0xff] }
   0x2   :  { %40 = vmatpush.msra.mxu0 %v19_v0 }
   0x3   :  { %8 = vsyncpa [#allocation3], 0  ;;  %v16_v3 = vld [vmem:[%s164_s1] sm:$0xff]  ;;  %vm24_vm0 = vcmask 261120   ;;  %s79_s25 = sshll.u32 %s166_s3, 4  ;;  %vm70_vm5 = vcmask 80896   ;;  %s80_s25 = int_to_ptr.hbm [resolvable:$true] %s79_s25 }
   0x4   :  { %41 = vmatpush.msra.mxu0 %v18_v1  ;;  %v15_v4 = vld [vmem:[%s163_s0] sm:$0xff]  ;;  %s121_s0 = smov [#allocation2]  }
   0x5   :  { %v90_v5 = vld [vmem:[%s165_s2] ss:$0 sm:$0xff]  ;;  %s77_s1 = sshll.u32 %s121_s0, 4  ;;  %s78_s1 = int_to_ptr.vmem [resolvable:$true] %s77_s1 }
   0x6   :  { %42 = vmatpush.msra.mxu0 %v17_v2 }
   0x8   :  { %43 = vmatpush.msra.mxu0 %v16_v3 }
   0x9   :  { %88 = vmatmul.msk.f32.vlgmr.msra.gmra.mxu0 %vm24_vm0, %v15_v4 }
  0x86   :  { %v45_v6 = vpop.f32.mrf.mxu0 }
  0x87   :  { %v46_v7 = vadd.f32 %v90_v5, %v45_v6 }
  0x89   :  { %48 = vmax.xlane.f32.xlu0 %v46_v7 }
  0xfc   :  { %v49_v8 = vpop.xlane.xlu0 %48 }
  0xfd   :  { %v50_v9 = vsub.f32 %v46_v7, %v49_v8 }
  0xff   :  { %v51_v10 = vmul.f32 1.442695, %v50_v9 }
 0x101   :  { %91 = vpow2.f32 %v51_v10 }
 0x107   :  { %v92_v11 = vpop.eup %91 }
 0x108   :  { %53 = vadd.xlane.f32.xlu0 %v92_v11 }
 0x17b   :  { %v54_v12 = vpop.xlane.xlu0 %53 }
 0x17c   :  { %93 = vrcp.f32 %v54_v12  ;;  %v66_v16 = vand.u32 2147483648, %v54_v12  ;;  %v64_v18 = vand.u32 2147483647, %v54_v12  ;;  %vm60_vm2 = vweird.f32 %v54_v12 }
 0x17e   :  { %v67_v20 = vor.u32 1.1754944e-38, %v66_v16  ;;  %vm65_vm4 = vcmp.eq.f32.partialorder %v64_v18, 8.507059e+37 }
 0x182   :  { %v94_v13 = vpop.eup %93 }
 0x183   :  { %v56_v14 = vmul.f32 %v94_v13, %v54_v12  ;;  %vm61_vm1 = vweird.f32 %v94_v13 }
 0x184   :  { %vm62_vm3 = vmor %vm60_vm2, %vm61_vm1 }
 0x185   :  { %v57_v15 = vsub.f32 1.0, %v56_v14 }
 0x187   :  { %v58_v17 = vmul.f32 %v94_v13, %v57_v15 }
 0x189   :  { %v59_v19 = vadd.f32 %v94_v13, %v58_v17 }
 0x18b   :  { %v63_v21 = vsel %vm62_vm3, %v94_v13, %v59_v19 }
 0x18c   :  { %v68_v22 = vsel %vm65_vm4, %v67_v20, %v63_v21 }
 0x18d   :  { %v69_v23 = vmul.f32 %v92_v11, %v68_v22 }
 0x18f   :  { %71 = vst.msk [vmem:[#allocation2] sm:$0xff] %vm70_vm5, %v69_v23 }
 0x190   :  { %82 = dma.vmem_to_hbm [thread:$0]  %s78_s1, 128, %s80_s25, [#allocation3]  }
 0x191   :  { %119 = dma.done.wait [#allocation3], 128  }
 0x192   :  { %120 = vsyncadd [#allocation3], 4294967168 }
 0x193   :  { %87 = vsyncpa [#allocation3], 1 }

</bundles_post_ra>
